<compile_context>
chip_gen: v7x
topology: tpu7x:2x2x1
jax: 0.10.0
libtpu: 0.0.40
codegen_flags: <defaults>
</compile_context>

<pallas_src>
import jax
import jax.numpy as jnp
from jax.experimental import pallas as pl
from jax.experimental.pallas import tpu as pltpu

# ---------------------------------------------------------------------------
# Problem sizes (small, consistent with Network(len_feature, feature_dim, class_num))
# ---------------------------------------------------------------------------
B = 2            # batch
T = 8            # sequence length (time); power of two
C = 32           # len_feature
FEAT_DIM = 16    # feature_dim
N_CLASS = 4      # class_num
EPS = 1e-12      # torch.nn.functional.normalize eps

N = 2 * B                      # x_i and x_j stacked along batch
NT = N * T                     # flattened (batch*time) rows
OUT_W = FEAT_DIM + N_CLASS     # packed output width: [z | c]

# Parameter-slab row offsets (all sublane-aligned: multiples of 8; everything lane-0 aligned)
R_W0 = 0            # conv tap 0 (acts on x[t-1]) : (C, C)
R_W1 = C            # conv tap 1 (acts on x[t])   : (C, C)
R_W2 = 2 * C        # conv tap 2 (acts on x[t+1]) : (C, C)
R_WP = 3 * C        # fused first layers [wi1 | wp1] : (C, 2C)
R_WQ = 4 * C        # block-diagonal second layers   : (2C, FEAT_DIM + N_CLASS)
R_BC = 6 * C        # conv bias                  (1, C)
R_B1 = R_BC + 8     # fused first-layer bias     (1, 2C)
R_B2 = R_B1 + 8     # fused second-layer bias    (1, FEAT_DIM + N_CLASS)
P_ROWS = R_B2 + 8   # 216 rows total (multiple of 8)
P_LANES = 128


def network_kernel(xi_ref, xj_ref, p_ref, out_ref):
    f32 = jnp.float32

    # Stack both streams along the sublane axis inside the kernel (no wrapper copy).
    x = jnp.concatenate([xi_ref[...], xj_ref[...]], axis=0)          # (NT, C)

    # Parameter slab slices: all sublane-aligned rows, lane-0 aligned -> free slices.
    w0 = p_ref[R_W0:R_W0 + C, 0:C]
    w1 = p_ref[R_W1:R_W1 + C, 0:C]
    w2 = p_ref[R_W2:R_W2 + C, 0:C]
    wp = p_ref[R_WP:R_WP + C, 0:2 * C]
    wq = p_ref[R_WQ:R_WQ + 2 * C, 0:OUT_W]
    bc = p_ref[R_BC:R_BC + 1, 0:C]
    b1 = p_ref[R_B1:R_B1 + 1, 0:2 * C]
    b2 = p_ref[R_B2:R_B2 + 1, 0:OUT_W]

    # "same"-padded time shifts via sublane roll + per-sequence boundary masks.
    # T is a power of two -> bitwise-and instead of modulo.
    row = jax.lax.broadcasted_iota(jnp.int32, (NT, C), 0)
    t = row & (T - 1)
    x_prev = jnp.where(t == 0, 0.0, pltpu.roll(x, 1, axis=0))           # x_prev[r] = x[r-1]
    x_next = jnp.where(t == T - 1, 0.0, pltpu.roll(x, NT - 1, axis=0))  # x_next[r] = x[r+1]

    # Conv1d(k=3, pad=1) + ReLU as three accumulated MXU dots (no lane concatenate).
    y = (jnp.dot(x_prev, w0, preferred_element_type=f32)
         + jnp.dot(x, w1, preferred_element_type=f32)
         + jnp.dot(x_next, w2, preferred_element_type=f32)
         + bc)
    y = jnp.maximum(y, 0.0)

    # Mean over time per sequence, then clamped L2 normalize (matches torch F.normalize).
    h = jnp.mean(y.reshape(N, T, C), axis=1)                          # (N, C)
    hn = h * jax.lax.rsqrt(
        jnp.maximum(jnp.sum(h * h, axis=1, keepdims=True), EPS * EPS))

    # Fused first layers of instance + cluster projectors: hn @ [wi1 | wp1] -> ReLU.
    a1 = jnp.maximum(
        jnp.dot(hn, wp, preferred_element_type=f32) + b1, 0.0)        # (N, 2C)
    # Fused block-diagonal second layers -> packed [z_raw | logits] in one tile.
    a2 = jnp.dot(a1, wq, preferred_element_type=f32) + b2             # (N, FEAT_DIM+N_CLASS)

    # Masked epilogue (no lane slices / shuffles):
    #   lanes [0:FEAT_DIM)        -> L2 normalize (instance head)
    #   lanes [FEAT_DIM:OUT_W)    -> softmax      (cluster head)
    lane = jax.lax.broadcasted_iota(jnp.int32, (N, OUT_W), 1)
    is_z = lane < FEAT_DIM

    ss = jnp.sum(jnp.where(is_z, a2 * a2, 0.0), axis=1, keepdims=True)
    z_scale = jax.lax.rsqrt(jnp.maximum(ss, EPS * EPS))

    m = jnp.max(jnp.where(is_z, -jnp.inf, a2), axis=1, keepdims=True)
    e = jnp.exp(a2 - m)
    denom = jnp.sum(jnp.where(is_z, 0.0, e), axis=1, keepdims=True)

    # Single full-block store: [z | c] for all 2B rows at once.
    out_ref[...] = jnp.where(is_z, a2 * z_scale, e / denom)


def pack_params(p):
    """One-time host-side packing of the 14 parameter tensors into ONE (216,128) slab."""
    f32 = jnp.float32
    slab = jnp.zeros((P_ROWS, P_LANES), f32)
    slab = slab.at[R_W0:R_W0 + C, 0:C].set(p["w0"])
    slab = slab.at[R_W1:R_W1 + C, 0:C].set(p["w1"])
    slab = slab.at[R_W2:R_W2 + C, 0:C].set(p["w2"])
    slab = slab.at[R_WP:R_WP + C, 0:C].set(p["wi1"])
    slab = slab.at[R_WP:R_WP + C, C:2 * C].set(p["wp1"])
    slab = slab.at[R_WQ:R_WQ + C, 0:FEAT_DIM].set(p["wi2"])
    slab = slab.at[R_WQ + C:R_WQ + 2 * C, FEAT_DIM:OUT_W].set(p["wp2"])
    slab = slab.at[R_BC, 0:C].set(p["bc"][0])
    slab = slab.at[R_B1, 0:C].set(p["bi1"][0])
    slab = slab.at[R_B1, C:2 * C].set(p["bp1"][0])
    slab = slab.at[R_B2, 0:FEAT_DIM].set(p["bi2"][0])
    slab = slab.at[R_B2, FEAT_DIM:OUT_W].set(p["bp2"][0])
    return slab


def network_forward(x_i, x_j, params_slab):
    """x_i, x_j: (B, T, C) float32. Returns (z_i, z_j, c_i, c_j)."""
    # Row-major reshapes are free; the actual stacking happens inside the kernel.
    xi2 = x_i.reshape(B * T, C)
    xj2 = x_j.reshape(B * T, C)

    vmem = pl.BlockSpec(memory_space=pltpu.MemorySpace.VMEM)
    flops = 2 * NT * C * (3 * C) + 2 * N * C * (2 * C) + 2 * N * (2 * C) * OUT_W
    bytes_acc = (2 * B * T * C + P_ROWS * P_LANES + N * OUT_W) * 4

    out = pl.pallas_call(
        network_kernel,
        out_shape=jax.ShapeDtypeStruct((N, OUT_W), jnp.float32),
        in_specs=[vmem, vmem, vmem],
        out_specs=vmem,
        cost_estimate=pl.CostEstimate(
            flops=flops, transcendentals=N * OUT_W + 2 * N, bytes_accessed=bytes_acc),
    )(xi2, xj2, params_slab)

    z_all = out[:, :FEAT_DIM]
    c_all = out[:, FEAT_DIM:]
    return z_all[:B], z_all[B:], c_all[:B], c_all[B:]


# ---------------------------------------------------------------------------
# Pure-JAX reference (mirrors the PyTorch forward) for validation.
# ---------------------------------------------------------------------------
def reference_forward(x_i, x_j, p):
    def one(x):
        xpad = jnp.pad(x, ((0, 0), (1, 1), (0, 0)))
        y = (jnp.einsum("btc,cd->btd", xpad[:, :-2], p["w0"])
             + jnp.einsum("btc,cd->btd", xpad[:, 1:-1], p["w1"])
             + jnp.einsum("btc,cd->btd", xpad[:, 2:], p["w2"])
             + p["bc"])
        y = jnp.maximum(y, 0.0)
        h = y.mean(axis=1)
        hn = h / jnp.maximum(jnp.linalg.norm(h, axis=1, keepdims=True), EPS)
        a = jnp.maximum(hn @ p["wi1"] + p["bi1"], 0.0)
        z = a @ p["wi2"] + p["bi2"]
        z = z / jnp.maximum(jnp.linalg.norm(z, axis=1, keepdims=True), EPS)
        g = jnp.maximum(hn @ p["wp1"] + p["bp1"], 0.0)
        c = jax.nn.softmax(g @ p["wp2"] + p["bp2"], axis=1)
        return z, c

    z_i, c_i = one(x_i)
    z_j, c_j = one(x_j)
    return z_i, z_j, c_i, c_j


def make_params(key):
    ks = jax.random.split(key, 10)
    scale = 0.1
    # Conv1d(C, C, k=3): torch stores (C_out, C_in, 3); here we keep per-tap (C_in, C_out).
    # TODO(synk): when loading a real torch checkpoint, transpose each tap of the conv weight.
    w_conv = scale * jax.random.normal(ks[0], (3, C, C), jnp.float32)
    return {
        "w0": w_conv[0], "w1": w_conv[1], "w2": w_conv[2],
        "bc": scale * jax.random.normal(ks[1], (1, C), jnp.float32),
        # instance projector: Linear(C, C) -> ReLU -> Linear(C, FEAT_DIM)
        "wi1": scale * jax.random.normal(ks[2], (C, C), jnp.float32),
        "bi1": scale * jax.random.normal(ks[3], (1, C), jnp.float32),
        "wi2": scale * jax.random.normal(ks[4], (C, FEAT_DIM), jnp.float32),
        "bi2": scale * jax.random.normal(ks[5], (1, FEAT_DIM), jnp.float32),
        # cluster projector: Linear(C, C) -> ReLU -> Linear(C, N_CLASS) -> Softmax
        "wp1": scale * jax.random.normal(ks[6], (C, C), jnp.float32),
        "bp1": scale * jax.random.normal(ks[7], (1, C), jnp.float32),
        "wp2": scale * jax.random.normal(ks[8], (C, N_CLASS), jnp.float32),
        "bp2": scale * jax.random.normal(ks[9], (1, N_CLASS), jnp.float32),
    }


if __name__ == "__main__":
    key = jax.random.PRNGKey(0)
    k_xi, k_xj, k_p = jax.random.split(key, 3)
    x_i = jax.random.normal(k_xi, (B, T, C), jnp.float32)
    x_j = jax.random.normal(k_xj, (B, T, C), jnp.float32)
    params = make_params(k_p)
    params_slab = pack_params(params)   # one-time packing into a single (216, 128) slab

    z_i, z_j, c_i, c_j = jax.block_until_ready(network_forward(x_i, x_j, params_slab))

    rz_i, rz_j, rc_i, rc_j = reference_forward(x_i, x_j, params)
    for got, want in ((z_i, rz_i), (z_j, rz_j), (c_i, rc_i), (c_j, rc_j)):
        assert jnp.allclose(got, want, rtol=1e-5, atol=1e-5), "mismatch vs reference"

    print("KERNEL_OK")
</pallas_src>

<mosaic_0001>
module attributes {stable_mosaic.version = 11 : i64} {
  func.func @network_kernel(%arg0: memref<16x32xf32, #tpu.memory_space<vmem>>, %arg1: memref<16x32xf32, #tpu.memory_space<vmem>>, %arg2: memref<216x128xf32, #tpu.memory_space<vmem>>, %arg3: memref<4x20xf32, #tpu.memory_space<vmem>>) attributes {dimension_semantics = [], scalar_prefetch = 0 : i64, scratch_operands = 0 : i64, tpu.core_type = #tpu.core_type<tc>} {
    %c0 = arith.constant 0 : index
    %c0_0 = arith.constant 0 : index
    %0 = vector.load %arg0[%c0, %c0_0] : memref<16x32xf32, #tpu.memory_space<vmem>>, vector<16x32xf32>
    %c0_1 = arith.constant 0 : index
    %c0_2 = arith.constant 0 : index
    %1 = vector.load %arg1[%c0_1, %c0_2] : memref<16x32xf32, #tpu.memory_space<vmem>>, vector<16x32xf32>
    %2 = tpu.concatenate %0, %1 in 0 : vector<16x32xf32>, vector<16x32xf32> -> vector<32x32xf32>
    %c0_3 = arith.constant 0 : index
    %c0_4 = arith.constant 0 : index
    %3 = vector.load %arg2[%c0_3, %c0_4] : memref<216x128xf32, #tpu.memory_space<vmem>>, vector<32x32xf32>
    %c32 = arith.constant 32 : index
    %c0_5 = arith.constant 0 : index
    %4 = vector.load %arg2[%c32, %c0_5] : memref<216x128xf32, #tpu.memory_space<vmem>>, vector<32x32xf32>
    %c64 = arith.constant 64 : index
    %c0_6 = arith.constant 0 : index
    %5 = vector.load %arg2[%c64, %c0_6] : memref<216x128xf32, #tpu.memory_space<vmem>>, vector<32x32xf32>
    %c96 = arith.constant 96 : index
    %c0_7 = arith.constant 0 : index
    %6 = vector.load %arg2[%c96, %c0_7] : memref<216x128xf32, #tpu.memory_space<vmem>>, vector<32x64xf32>
    %c128 = arith.constant 128 : index
    %c0_8 = arith.constant 0 : index
    %7 = vector.load %arg2[%c128, %c0_8] : memref<216x128xf32, #tpu.memory_space<vmem>>, vector<64x20xf32>
    %c192 = arith.constant 192 : index
    %c0_9 = arith.constant 0 : index
    %8 = vector.load %arg2[%c192, %c0_9] : memref<216x128xf32, #tpu.memory_space<vmem>>, vector<1x32xf32>
    %c200 = arith.constant 200 : index
    %c0_10 = arith.constant 0 : index
    %9 = vector.load %arg2[%c200, %c0_10] : memref<216x128xf32, #tpu.memory_space<vmem>>, vector<1x64xf32>
    %c208 = arith.constant 208 : index
    %c0_11 = arith.constant 0 : index
    %10 = vector.load %arg2[%c208, %c0_11] : memref<216x128xf32, #tpu.memory_space<vmem>>, vector<1x20xf32>
    %11 = tpu.iota {dimensions = array<i32: 0>} : vector<32x32xi32>
    %c7_i32 = arith.constant 7 : i32
    %12 = vector.broadcast %c7_i32 : i32 to vector<32x32xi32>
    %13 = arith.andi %11, %12 : vector<32x32xi32>
    %c0_i32 = arith.constant 0 : i32
    %14 = vector.broadcast %c0_i32 : i32 to vector<32x32xi32>
    %15 = arith.cmpi eq, %13, %14 : vector<32x32xi32>
    %c1_i32 = arith.constant 1 : i32
    %16 = tpu.dynamic_rotate %2 by %c1_i32 dim 0 : vector<32x32xf32>, i32 -> vector<32x32xf32>
    %cst = arith.constant 0.000000e+00 : f32
    %17 = vector.broadcast %cst : f32 to vector<32x32xf32>
    %18 = arith.select %15, %17, %16 : vector<32x32xi1>, vector<32x32xf32>
    %c7_i32_12 = arith.constant 7 : i32
    %19 = vector.broadcast %c7_i32_12 : i32 to vector<32x32xi32>
    %20 = arith.cmpi eq, %13, %19 : vector<32x32xi32>
    %c31_i32 = arith.constant 31 : i32
    %21 = tpu.dynamic_rotate %2 by %c31_i32 dim 0 : vector<32x32xf32>, i32 -> vector<32x32xf32>
    %cst_13 = arith.constant 0.000000e+00 : f32
    %22 = vector.broadcast %cst_13 : f32 to vector<32x32xf32>
    %23 = arith.select %20, %22, %21 : vector<32x32xi1>, vector<32x32xf32>
    %cst_14 = arith.constant dense<0.000000e+00> : vector<32x32xf32>
    %24 = tpu.matmul %18, %3, %cst_14 {dimension_numbers = #tpu.dot_dimension_numbers<[1], [0], [0], [1], [0, 0, 1, 1], [], []>} : vector<32x32xf32>, vector<32x32xf32>, vector<32x32xf32> -> vector<32x32xf32>
    %cst_15 = arith.constant dense<0.000000e+00> : vector<32x32xf32>
    %25 = tpu.matmul %2, %4, %cst_15 {dimension_numbers = #tpu.dot_dimension_numbers<[1], [0], [0], [1], [0, 0, 1, 1], [], []>} : vector<32x32xf32>, vector<32x32xf32>, vector<32x32xf32> -> vector<32x32xf32>
    %26 = arith.addf %24, %25 : vector<32x32xf32>
    %cst_16 = arith.constant dense<0.000000e+00> : vector<32x32xf32>
    %27 = tpu.matmul %23, %5, %cst_16 {dimension_numbers = #tpu.dot_dimension_numbers<[1], [0], [0], [1], [0, 0, 1, 1], [], []>} : vector<32x32xf32>, vector<32x32xf32>, vector<32x32xf32> -> vector<32x32xf32>
    %28 = arith.addf %26, %27 : vector<32x32xf32>
    %29 = vector.broadcast %8 : vector<1x32xf32> to vector<32x32xf32>
    %30 = arith.addf %28, %29 : vector<32x32xf32>
    %cst_17 = arith.constant 0.000000e+00 : f32
    %31 = vector.broadcast %cst_17 : f32 to vector<32x32xf32>
    %32 = arith.maximumf %30, %31 : vector<32x32xf32>
    %33 = vector.shape_cast %32 : vector<32x32xf32> to vector<4x8x32xf32>
    %cst_18 = arith.constant dense<0.000000e+00> : vector<4x32xf32>
    %34 = vector.multi_reduction <add>, %33, %cst_18 [1] : vector<4x8x32xf32> to vector<4x32xf32>
    %cst_19 = arith.constant 8.000000e+00 : f32
    %35 = vector.broadcast %cst_19 : f32 to vector<4x32xf32>
    %36 = arith.divf %34, %35 : vector<4x32xf32>
    %37 = arith.mulf %36, %36 : vector<4x32xf32>
    %cst_20 = arith.constant dense<0.000000e+00> : vector<4xf32>
    %38 = vector.multi_reduction <add>, %37, %cst_20 [1] : vector<4x32xf32> to vector<4xf32>
    %39 = vector.shape_cast %38 : vector<4xf32> to vector<4x1xf32>
    %cst_21 = arith.constant 1.000000e-24 : f32
    %40 = vector.broadcast %cst_21 : f32 to vector<4x1xf32>
    %41 = arith.maximumf %39, %40 : vector<4x1xf32>
    %42 = math.rsqrt %41 : vector<4x1xf32>
    %43 = vector.broadcast %42 : vector<4x1xf32> to vector<4x32xf32>
    %44 = arith.mulf %36, %43 : vector<4x32xf32>
    %cst_22 = arith.constant dense<0.000000e+00> : vector<4x64xf32>
    %45 = tpu.matmul %44, %6, %cst_22 {dimension_numbers = #tpu.dot_dimension_numbers<[1], [0], [0], [1], [0, 0, 1, 1], [], []>} : vector<4x32xf32>, vector<32x64xf32>, vector<4x64xf32> -> vector<4x64xf32>
    %46 = vector.broadcast %9 : vector<1x64xf32> to vector<4x64xf32>
    %47 = arith.addf %45, %46 : vector<4x64xf32>
    %cst_23 = arith.constant 0.000000e+00 : f32
    %48 = vector.broadcast %cst_23 : f32 to vector<4x64xf32>
    %49 = arith.maximumf %47, %48 : vector<4x64xf32>
    %cst_24 = arith.constant dense<0.000000e+00> : vector<4x20xf32>
    %50 = tpu.matmul %49, %7, %cst_24 {dimension_numbers = #tpu.dot_dimension_numbers<[1], [0], [0], [1], [0, 0, 1, 1], [], []>} : vector<4x64xf32>, vector<64x20xf32>, vector<4x20xf32> -> vector<4x20xf32>
    %51 = vector.broadcast %10 : vector<1x20xf32> to vector<4x20xf32>
    %52 = arith.addf %50, %51 : vector<4x20xf32>
    %53 = tpu.iota {dimensions = array<i32: 1>} : vector<4x20xi32>
    %c16_i32 = arith.constant 16 : i32
    %54 = vector.broadcast %c16_i32 : i32 to vector<4x20xi32>
    %55 = arith.cmpi slt, %53, %54 : vector<4x20xi32>
    %56 = arith.mulf %52, %52 : vector<4x20xf32>
    %cst_25 = arith.constant 0.000000e+00 : f32
    %57 = vector.broadcast %cst_25 : f32 to vector<4x20xf32>
    %58 = arith.select %55, %56, %57 : vector<4x20xi1>, vector<4x20xf32>
    %cst_26 = arith.constant dense<0.000000e+00> : vector<4xf32>
    %59 = vector.multi_reduction <add>, %58, %cst_26 [1] : vector<4x20xf32> to vector<4xf32>
    %60 = vector.shape_cast %59 : vector<4xf32> to vector<4x1xf32>
    %cst_27 = arith.constant 1.000000e-24 : f32
    %61 = vector.broadcast %cst_27 : f32 to vector<4x1xf32>
    %62 = arith.maximumf %60, %61 : vector<4x1xf32>
    %63 = math.rsqrt %62 : vector<4x1xf32>
    %cst_28 = arith.constant 0xFF800000 : f32
    %64 = vector.broadcast %cst_28 : f32 to vector<4x20xf32>
    %65 = arith.select %55, %64, %52 : vector<4x20xi1>, vector<4x20xf32>
    %cst_29 = arith.constant dense<0xFF800000> : vector<4xf32>
    %66 = vector.multi_reduction <maximumf>, %65, %cst_29 [1] : vector<4x20xf32> to vector<4xf32>
    %67 = vector.shape_cast %66 : vector<4xf32> to vector<4x1xf32>
    %68 = vector.broadcast %67 : vector<4x1xf32> to vector<4x20xf32>
    %69 = arith.subf %52, %68 : vector<4x20xf32>
    %70 = math.exp %69 : vector<4x20xf32>
    %cst_30 = arith.constant 0.000000e+00 : f32
    %71 = vector.broadcast %cst_30 : f32 to vector<4x20xf32>
    %72 = arith.select %55, %71, %70 : vector<4x20xi1>, vector<4x20xf32>
    %cst_31 = arith.constant dense<0.000000e+00> : vector<4xf32>
    %73 = vector.multi_reduction <add>, %72, %cst_31 [1] : vector<4x20xf32> to vector<4xf32>
    %74 = vector.shape_cast %73 : vector<4xf32> to vector<4x1xf32>
    %75 = vector.broadcast %63 : vector<4x1xf32> to vector<4x20xf32>
    %76 = arith.mulf %52, %75 : vector<4x20xf32>
    %77 = vector.broadcast %74 : vector<4x1xf32> to vector<4x20xf32>
    %78 = arith.divf %70, %77 : vector<4x20xf32>
    %79 = arith.select %55, %76, %78 : vector<4x20xi1>, vector<4x20xf32>
    %c0_32 = arith.constant 0 : index
    %c0_33 = arith.constant 0 : index
    %80 = vector.load %arg3[%c0_32, %c0_33] : memref<4x20xf32, #tpu.memory_space<vmem>>, vector<4x20xf32>
    tpu.vector_store %arg3[%c0_32, %c0_33], %79 {strides = array<i32>} : memref<4x20xf32, #tpu.memory_space<vmem>>, vector<4x20xf32>,
    return
  }
}

</mosaic_0001>

<bundles_post_ra>
// kernel: tpu_custom_call.1
= control target key start
LH: loop header
LB: loop body
LE: loop exit
PB: predicated region body
PF: predicated region fallthrough
CT: control target
= control target key end

     0   :  { %8 = vsyncpa [#allocation3], 0  ;;  %s1186_s0 = inlined_call_operand.hbm [shape: f32[16,32], index: 0, kind: input, shape index: {}]   ;;  %s1187_s1 = inlined_call_operand.hbm [shape: f32[16,32], index: 1, kind: input, shape index: {}]   ;;  %s1188_s2 = inlined_call_operand.hbm [shape: f32[216,128], index: 2, kind: input, shape index: {}]   ;;  %s1189_s3 = inlined_call_operand.hbm [shape: f32[4,20], index: 3, kind: output, shape index: {}]  }
   0x1   :  { %9 = vsyncpa [#allocation6], 0 }
   0x2   :  { %10 = vsyncpa [#allocation4], 0  ;;  %s1000_s12 = smov [#allocation5]   ;;  %s1001_s14 = smov [#allocation2]  }
   0x3   :  { %s28_s13 = sshll.u32 %s1000_s12, 4  ;;  %s16_s15 = sshll.u32 %s1001_s14, 4  ;;  %s29_s13 = int_to_ptr.vmem [resolvable:$true] %s28_s13  ;;  %s1029_s15 = int_to_ptr.vmem [resolvable:$true] %s16_s15 }
   0x4   :  { %s906_s18 = scalar_lea.hbm %s1187_s1, 256 }
   0x5   :  { %p907_p0 = scmp.ne.s32.totalorder %s1187_s1, %s906_s18  ;;  %p910_p1 = scmp.lt.u32.totalorder %s906_s18, %s1187_s1 }
   0x7   :  { %p912_p2 = pnand %p910_p1, %p907_p0 }
   0x9   :  { %915 = shalt.err (!%p912_p2)
}
   0xa   :  { %s916_s23 = scalar_lea.vmem %s29_s13, 256  ;;  %p921_p4 = scmp.lt.s32.totalorder %s29_s13, %s29_s13 }
   0xb   :  { %p917_p3 = scmp.ne.s32.totalorder %s29_s13, %s916_s23  ;;  %p922_p5 = scmp.lt.s32.totalorder %s916_s23, %s916_s23 }
   0xd   :  { %p923_p6 = por %p922_p5, %p921_p4 }
   0xf   :  { %p924_p7 = pnand %p923_p6, %p917_p3 }
  0x11   :  { %927 = shalt.err (!%p924_p7)
}
  0x12   :  { %s1002_s24 = smov 128   ;;  %s1003_s25 = smov 8  }
  0x13   :  { %34 = dma.hbm_to_vmem [thread:$0]  %s1187_s1, 256, %s29_s13, [#allocation6], %s1002_s24, %s1002_s24, %s1003_s25  }
  0x14   :  { %s928_s30 = scalar_lea.hbm %s1186_s0, 256 }
  0x15   :  { %p929_p8 = scmp.ne.s32.totalorder %s1186_s0, %s928_s30  ;;  %p932_p9 = scmp.lt.u32.totalorder %s928_s30, %s1186_s0 }
  0x17   :  { %p934_p10 = pnand %p932_p9, %p929_p8 }
  0x19   :  { %937 = shalt.err (!%p934_p10)
}
  0x1a   :  { %s938_s8 = scalar_lea.vmem %s1029_s15, 256  ;;  %p943_p12 = scmp.lt.s32.totalorder %s1029_s15, %s1029_s15 }
  0x1b   :  { %p939_p11 = scmp.ne.s32.totalorder %s1029_s15, %s938_s8  ;;  %p944_p13 = scmp.lt.s32.totalorder %s938_s8, %s938_s8 }
  0x1d   :  { %p945_p0 = por %p944_p13, %p943_p12 }
  0x1f   :  { %p946_p1 = pnand %p945_p0, %p939_p11 }
  0x21   :  { %949 = shalt.err (!%p946_p1)
}
  0x22   :  { %22 = dma.hbm_to_vmem [thread:$0]  %s1186_s0, 256, %s1029_s15, [#allocation3], %s1002_s24, %s1002_s24, %s1003_s25  }
  0x23   :  { %s1004_s10 = smov [#allocation7]   ;;  %s950_s14 = scalar_lea.hbm %s1188_s2, 3456 }
  0x24   :  { %s40_s11 = sshll.u32 %s1004_s10, 4  ;;  %p951_p2 = scmp.ne.s32.totalorder %s1188_s2, %s950_s14  ;;  %s41_s11 = int_to_ptr.vmem [resolvable:$true] %s40_s11 }
  0x25   :  { %p954_p3 = scmp.lt.u32.totalorder %s950_s14, %s1188_s2 }
  0x27   :  { %p956_p4 = pnand %p954_p3, %p951_p2 }
  0x29   :  { %959 = shalt.err (!%p956_p4)
}
  0x2a   :  { %s960_s20 = scalar_lea.vmem %s41_s11, 3456  ;;  %p965_p6 = scmp.lt.s32.totalorder %s41_s11, %s41_s11 }
  0x2b   :  { %p961_p5 = scmp.ne.s32.totalorder %s41_s11, %s960_s20  ;;  %p966_p7 = scmp.lt.s32.totalorder %s960_s20, %s960_s20 }
  0x2d   :  { %p967_p8 = por %p966_p7, %p965_p6 }
  0x2f   :  { %p968_p9 = pnand %p967_p8, %p961_p5 }
  0x31   :  { %971 = shalt.err (!%p968_p9)
}
  0x32   :  { %46 = dma.hbm_to_vmem [thread:$0]  %s1188_s2, 3456, %s41_s11, [#allocation6], %s1002_s24, %s1002_s24, %s1003_s25  }
  0x33   :  { %994 = dma.done.wait [#allocation3], 256  }
  0x34   :  { %995 = vsyncadd [#allocation3], 4294967040 }
  0x35   :  { %996 = dma.done.wait [#allocation6], 3712  }
  0x36   :  { %997 = vsyncadd [#allocation6], 4294963584  ;;  %v87_v0 = vlaneseq  ;;  %vm130_vm0 = vcmask 261120   ;;  %v64_v1 = vld [vmem:[#allocation7 + $0x20] sm:$0xff]  ;;  %v65_v2 = vld [vmem:[#allocation7 + $0x28] sm:$0xff]  ;;  %vm479_vm11 = vcmask 1041409  }
  0x37   :  { %v66_v3 = vld [vmem:[#allocation7 + $0x30] sm:$0xff]  ;;  %v839_v4 = vpack.c.bf16 %v65_v2, %v64_v1  ;;  %v67_v5 = vld [vmem:[#allocation7 + $0x38] sm:$0xff]  ;;  %v1081_v6 = vld [vmem:[#allocation2] sm:$0xff]  ;;  %vm481_vm12 = vcmask 1042434   ;;  %vm483_vm13 = vcmask 1043459   ;;  %vm486_vm14 = vcmask 257024  }
  0x38   :  { %v1084_v7 = vshrl.u32 %v87_v0, 7  ;;  %v843_v8 = vpack.c.bf16 %v67_v5, %v66_v3  ;;  %775 = vmatprep.mubr.msk.f32.mxu0 %vm130_vm0, %v1081_v6  ;;  %v60_v9 = vld [vmem:[#allocation7] sm:$0xff]  ;;  %v61_v10 = vld [vmem:[#allocation7 + $0x8] sm:$0xff]  ;;  %v1088_v11 = vld [vmem:[#allocation5 + $0x8] sm:$0xff]  ;;  %v100_v14 = vrot.slane %v1081_v6, 7  ;;  %v117_v37 = vrot.slane %v1081_v6, 1 }
  0x39   :  { %840 = vmatprep.subr.bf16.mxu0 %v839_v4  ;;  %v847_v12 = vpack.c.bf16 %v61_v10, %v60_v9  ;;  %v103_v15 = vrot.slane %v1088_v11, 7  ;;  %v62_v16 = vld [vmem:[#allocation7 + $0x10] sm:$0xff]  ;;  %v63_v17 = vld [vmem:[#allocation7 + $0x18] sm:$0xff]  ;;  %v57_v20 = vld [vmem:[#allocation2 + $0x8] sm:$0xff]  ;;  %v120_v49 = vrot.slane %v1088_v11, 1  ;;  %vm1006_vm15 = vmmov 0  }
  0x3a   :  { %842 = vmatpush3.bf16.msra.mxu0 %v839_v4  ;;  %v89_v13 = vadd.s32 8, %v1084_v7  ;;  %v92_v18 = vand.u32 7, %v1084_v7  ;;  %v90_v19 = vadd.s32 16, %v1084_v7  ;;  %vm104_vm1 = vcmp.lt.s32.totalorder %v1084_v7, 1  ;;  %v58_v23 = vld [vmem:[#allocation5] sm:$0xff]  ;;  %v68_v29 = vld [vmem:[#allocation7 + $0x40] sm:$0xff] }
  0x3b   :  { %844 = vmatprep.subr.bf16.mxu0 %v843_v8  ;;  %v91_v21 = vadd.s32 24, %v1084_v7  ;;  %v101_v22 = vrot.slane %v57_v20, 7  ;;  %v851_v24 = vpack.c.bf16 %v63_v17, %v62_v16  ;;  %v102_v26 = vrot.slane %v58_v23, 7  ;;  %v69_v30 = vld [vmem:[#allocation7 + $0x48] sm:$0xff]  ;;  %v70_v41 = vld [vmem:[#allocation7 + $0x50] sm:$0xff]  ;;  %v71_v42 = vld [vmem:[#allocation7 + $0x58] sm:$0xff] }
  0x3c   :  { %v93_v25 = vand.u32 7, %v89_v13  ;;  %vm1097_vm2 = vcmp.eq.s32.totalorder %v92_v18, 0  ;;  %v108_v28 = vsel %vm104_vm1, %v103_v15, %v100_v14  ;;  %v94_v31 = vand.u32 7, %v90_v19  ;;  %v724_v59 = vld [vmem:[#allocation7 + $0xc0] ss:$0 sm:$0xff]  ;;  %s1008_s2 = smov [#allocation8]  }
  0x3d   :  { %v95_v32 = vand.u32 7, %v91_v21  ;;  %v109_v33 = vsel %vm1097_vm2, 0.0, %v108_v28  ;;  %v107_v35 = vsel %vm104_vm1, %v100_v14, %v101_v22  ;;  %v855_v36 = vpack.c.bf16 %v69_v30, %v68_v29  ;;  %s702_s21 = sshll.u32 %s1008_s2, 4  ;;  %s703_s21 = int_to_ptr.vmem [resolvable:$true] %s702_s21 }
  0x3e   :  { %846 = vmatpush3.bf16.msra.mxu0 %v843_v8  ;;  %vm1107_vm3 = vcmp.eq.s32.totalorder %v93_v25, 0  ;;  %v118_v38 = vrot.slane %v57_v20, 1  ;;  %vm1114_vm4 = vcmp.eq.s32.totalorder %v94_v31, 0  ;;  %v106_v40 = vsel %vm104_vm1, %v101_v22, %v102_v26  ;;  %s972_s22 = scalar_lea.vmem %s703_s21, 64  ;;  %p977_p11 = scmp.lt.s32.totalorder %s703_s21, %s703_s21 }
  0x3f   :  { %848 = vmatprep.subr.bf16.mxu0 %v847_v12  ;;  %vm121_vm5 = vcmp.lt.s32.totalorder %v1084_v7, 7  ;;  %v119_v43 = vrot.slane %v58_v23, 1  ;;  %v110_v44 = vsel %vm1107_vm3, 0.0, %v107_v35  ;;  %v111_v45 = vsel %vm1114_vm4, 0.0, %v106_v40  ;;  %p973_p10 = scmp.ne.s32.totalorder %s703_s21, %s972_s22  ;;  %p978_p12 = scmp.lt.s32.totalorder %s972_s22, %s972_s22 }
  0x40   :  { %vm1128_vm6 = vcmp.eq.s32.totalorder %v95_v32, 0  ;;  %v105_v47 = vsel %vm104_vm1, %v102_v26, %v103_v15  ;;  %v859_v48 = vpack.c.bf16 %v71_v42, %v70_v41  ;;  %vm113_vm7 = vcmp.eq.s32.totalorder %v92_v18, 7 }
  0x41   :  { %776 = vmatmul.mubr.msk.f32.vlgmr.msra.gmra.mrb[0].mxu0 %vm130_vm0, %v57_v20  ;;  %v124_v50 = vsel %vm121_vm5, %v117_v37, %v118_v38  ;;  %v112_v51 = vsel %vm1128_vm6, 0.0, %v105_v47  ;;  %vm114_vm8 = vcmp.eq.s32.totalorder %v93_v25, 7  ;;  %v123_v53 = vsel %vm121_vm5, %v118_v38, %v119_v43  ;;  %p979_p13 = por %p978_p12, %p977_p11 }
  0x42   :  { %850 = vmatpush3.bf16.msra.mxu0 %v847_v12  ;;  %778 = vmatprep.mubr.msk.f32.mxu0 %vm130_vm0, %v58_v23  ;;  %v126_v52 = vsel %vm113_vm7, 0.0, %v124_v50  ;;  %vm115_vm9 = vcmp.eq.s32.totalorder %v94_v31, 7  ;;  %v122_v54 = vsel %vm121_vm5, %v119_v43, %v120_v49  ;;  %v127_v55 = vsel %vm114_vm8, 0.0, %v123_v53  ;;  %v73_v50 = vld [vmem:[#allocation7 + $0x68] sm:$0xff] }
  0x43   :  { %852 = vmatprep.subr.bf16.mxu0 %v851_v24  ;;  %v128_v56 = vsel %vm115_vm9, 0.0, %v122_v54  ;;  %vm116_vm10 = vcmp.eq.s32.totalorder %v95_v32, 7  ;;  %v125_v57 = vsel %vm121_vm5, %v120_v49, %v117_v37  ;;  %v72_v49 = vld [vmem:[#allocation7 + $0x60] sm:$0xff]  ;;  %v75_v54 = vld [vmem:[#allocation7 + $0x78] sm:$0xff]  ;;  %vm674_vm2 = vcmask 158720   ;;  %p980_p0 = pnand %p979_p13, %p973_p10 }
  0x44   :  { %v129_v58 = vsel %vm116_vm10, 0.0, %v125_v57  ;;  %v864_v53 = vpack.c.bf16 %v73_v50, %v72_v49 }
  0x45   :  { %779 = vmatmul.mubr.msk.f32.gmra.mrb[2].mxu0 %vm130_vm0, %v1088_v11 }
  0x46   :  { %854 = vmatpush3.bf16.msra.mxu0 %v851_v24  ;;  %789 = vmatprep.mubr.msk.f32.mxu0 %vm130_vm0, %v109_v33 }
  0x47   :  { %856 = vmatprep.subr.bf16.mxu0 %v855_v36 }
  0x49   :  { %790 = vmatmul.mubr.msk.f32.vlgmr.msra.gmra.mrb[0].mxu0 %vm130_vm0, %v110_v44 }
  0x4a   :  { %858 = vmatpush3.bf16.msra.mxu0 %v855_v36  ;;  %792 = vmatprep.mubr.msk.f32.mxu0 %vm130_vm0, %v111_v45 }
  0x4b   :  { %860 = vmatprep.subr.bf16.mxu0 %v859_v48 }
  0x4d   :  { %793 = vmatmul.mubr.msk.f32.gmra.mrb[2].mxu0 %vm130_vm0, %v112_v51  ;;  %v74_v51 = vld [vmem:[#allocation7 + $0x70] sm:$0xff] }
  0x4e   :  { %862 = vmatpush3.bf16.msra.mxu0 %v859_v48  ;;  %803 = vmatprep.mubr.msk.f32.mxu0 %vm130_vm0, %v126_v52  ;;  %v1005_v52 = vmov 0.0|0.0  }
  0x4f   :  { %863 = vmatprep.subr.bf16.mxu1 %v1005_v52 }
  0x50   :  { %865 = vmatpush3.bf16.msra.mxu1 %v864_v53 }
  0x51   :  { %804 = vmatmul.mubr.msk.f32.vlgmr.msra.gmra.mrb[0].mxu0 %vm130_vm0, %v127_v55  ;;  %v1007_v55 = vmov 0.0   ;;  %866 = vmatprep.subr.bf16.mxu1 %v1005_v52 }
  0x52   :  { %806 = vmatprep.mubr.msk.f32.mxu0 %vm130_vm0, %v128_v56  ;;  %817 = vmatprep.mubr.msk.f32.mxu1 %vm1006_vm15, %v1007_v55  ;;  %v867_v56 = vpack.c.bf16 %v75_v54, %v74_v51 }
  0x54   :  { %868 = vmatpush3.bf16.msra.mxu1 %v867_v56 }
  0x55   :  { %807 = vmatmul.mubr.msk.f32.gmra.mrb[2].mxu0 %vm130_vm0, %v129_v58  ;;  %869 = vmatprep.subr.bf16.mxu1 %v1005_v52 }
 0x124   :  { %v805_v60 = vpop.f32.mrb[0].mxu0 }
 0x125   :  { %v431_v61 = vadd.f32 %v805_v60, %v724_v59  ;;  %v403_v62 = vpop.f32.mrb[1].mxu0 }
 0x126   :  { %v430_v63 = vadd.f32 %v724_v59, %v403_v62 }
 0x127   :  { %v435_v1 = vmax.f32 %v431_v61, 0.0 }
 0x128   :  { %v434_v2 = vmax.f32 %v430_v63, 0.0  ;;  %v808_v3 = vpop.f32.mrb[2].mxu0 }
 0x129   :  { %v445_v4 = vsel %vm130_vm0, %v435_v1, 0.0  ;;  %v433_v5 = vadd.f32 %v808_v3, %v724_v59  ;;  %v413_v6 = vpop.f32.mrb[3].mxu0  ;;  %v76_v3 = vld [vmem:[#allocation7 + $0x80] sm:$0xff] }
 0x12a   :  { %v446_v7 = vrot.slane %v445_v4, 4  ;;  %v438_v8 = vsel %vm130_vm0, %v434_v2, 0.0  ;;  %v432_v9 = vadd.f32 %v724_v59, %v413_v6 }
 0x12b   :  { %v439_v10 = vrot.slane %v438_v8, 4  ;;  %v437_v11 = vmax.f32 %v433_v5, 0.0 }
 0x12c   :  { %v447_v12 = vadd.f32 %v446_v7, %v445_v4  ;;  %v436_v13 = vmax.f32 %v432_v9, 0.0  ;;  %v77_v4 = vld [vmem:[#allocation7 + $0x88] sm:$0xff] }
 0x12d   :  { %v440_v14 = vadd.f32 %v439_v10, %v438_v8  ;;  %v459_v15 = vsel %vm130_vm0, %v437_v11, 0.0  ;;  %v870_v10 = vpack.c.bf16 %v77_v4, %v76_v3 }
 0x12e   :  { %v448_v16 = vrot.slane %v447_v12, 2  ;;  %v460_v17 = vrot.slane %v459_v15, 4  ;;  %v452_v18 = vsel %vm130_vm0, %v436_v13, 0.0  ;;  %v79_v13 = vld [vmem:[#allocation7 + $0x98] sm:$0xff] }
 0x12f   :  { %v441_v19 = vrot.slane %v440_v14, 2  ;;  %v453_v20 = vrot.slane %v452_v18, 4 }
 0x130   :  { %v449_v21 = vadd.f32 %v448_v16, %v447_v12  ;;  %v461_v22 = vadd.f32 %v460_v17, %v459_v15  ;;  %v78_v12 = vld [vmem:[#allocation7 + $0x90] sm:$0xff]  ;;  %v80_v16 = vld [vmem:[#allocation7 + $0xa0] sm:$0xff]  ;;  %v81_v17 = vld [vmem:[#allocation7 + $0xa8] sm:$0xff] }
 0x131   :  { %v442_v23 = vadd.f32 %v441_v19, %v440_v14  ;;  %v454_v24 = vadd.f32 %v453_v20, %v452_v18  ;;  %v873_v15 = vpack.c.bf16 %v79_v13, %v78_v12  ;;  %v876_v18 = vpack.c.bf16 %v81_v17, %v80_v16  ;;  %v82_v19 = vld [vmem:[#allocation7 + $0xb0] sm:$0xff]  ;;  %v83_v20 = vld [vmem:[#allocation7 + $0xb8] sm:$0xff] }
 0x132   :  { %v450_v25 = vrot.slane %v449_v21, 1  ;;  %v462_v26 = vrot.slane %v461_v22, 2 }
 0x133   :  { %v443_v27 = vrot.slane %v442_v23, 1  ;;  %v455_v28 = vrot.slane %v454_v24, 2 }
 0x134   :  { %v451_v29 = vadd.f32 %v450_v25, %v449_v21  ;;  %v463_v30 = vadd.f32 %v462_v26, %v461_v22  ;;  %v879_v21 = vpack.c.bf16 %v83_v20, %v82_v19  ;;  %v725_v22 = vld [vmem:[#allocation7 + $0xc8] ss:$0 sm:$0xff] }
 0x135   :  { %v444_v31 = vadd.f32 %v443_v27, %v442_v23  ;;  %v456_v32 = vadd.f32 %v455_v28, %v454_v24  ;;  %v670_v27 = vand.u32 127, %v87_v0  ;;  %v727_v28 = vld [vmem:[#allocation7 + $0xd0] ss:$0 sm:$0xff] }
 0x136   :  { %v468_v33 = vmul.f32 0.125, %v451_v29  ;;  %v464_v34 = vrot.slane %v463_v30, 1 }
 0x137   :  { %v467_v35 = vmul.f32 0.125, %v444_v31  ;;  %v457_v36 = vrot.slane %v456_v32, 1  ;;  %vm671_vm1 = vcmp.lt.s32.totalorder %v670_v27, 16 }
 0x138   :  { %v465_v37 = vadd.f32 %v464_v34, %v463_v30  ;;  %v472_v41 = vmul.f32 %v468_v33, %v468_v33 }
 0x139   :  { %v458_v38 = vadd.f32 %v457_v36, %v456_v32  ;;  %v471_v40 = vmul.f32 %v467_v35, %v467_v35 }
 0x13a   :  { %v470_v39 = vmul.f32 0.125, %v465_v37 }
 0x13b   :  { %v469_v42 = vmul.f32 0.125, %v458_v38  ;;  %v480_v45 = vsel %vm479_vm11, %v472_v41, %v471_v40 }
 0x13c   :  { %v474_v44 = vmul.f32 %v470_v39, %v470_v39 }
 0x13d   :  { %v473_v43 = vmul.f32 %v469_v42, %v469_v42 }
 0x13f   :  { %v482_v46 = vsel %vm481_vm12, %v473_v43, %v480_v45 }
 0x140   :  { %v484_v47 = vsel %vm483_vm13, %v474_v44, %v482_v46 }
 0x141   :  { %v487_v48 = vsel %vm486_vm14, %v484_v47, 0.0 }
 0x142   :  { %488 = vadd.xlane.f32.xlu0 %v487_v48 }
 0x1cf   :  { %v489_v57 = vpop.xlane.xlu0 %488 }
 0x1d0   :  { %v490_v58 = vmax.f32 %v489_v57, 1e-24 }
 0x1d2   :  { %898 = vrsqrt.f32 %v490_v58 }
 0x1dc   :  { %v899_v59 = vpop.eup %898 }
 0x1dd   :  { %v493_v60 = vrot.slane %v899_v59, 1  ;;  %v494_v61 = vrot.slane %v899_v59, 2  ;;  %v495_v62 = vrot.slane %v899_v59, 3  ;;  %v500_v5 = vmul.f32 %v899_v59, %v467_v35 }
 0x1df   :  { %v501_v63 = vmul.f32 %v493_v60, %v468_v33  ;;  %v502_v1 = vmul.f32 %v494_v61, %v469_v42  ;;  %v503_v2 = vmul.f32 %v495_v62, %v470_v39 }
 0x1e1   :  { %v512_v6 = vrot.slane %v501_v63, 7  ;;  %v514_v7 = vrot.slane %v502_v1, 6  ;;  %v516_v9 = vrot.slane %v503_v2, 5 }
 0x1e3   :  { %v513_v8 = vsel %vm479_vm11, %v512_v6, %v500_v5 }
 0x1e4   :  { %v515_v11 = vsel %vm481_vm12, %v514_v7, %v513_v8 }
 0x1e5   :  { %v517_v14 = vsel %vm483_vm13, %v516_v9, %v515_v11 }
 0x1e6   :  { %818 = vmatmul.mubr.msk.f32.vlgmr.msra.gmra.mrb[0].mxu1 %vm130_vm0, %v517_v14  ;;  %vm595_vm0 = vcmask 523264  }
 0x1e7   :  { %871 = vmatpush3.bf16.msra.mxu1 %v870_v10  ;;  %836 = vmatprep.mubr.msk.f32.mxu1 %vm1006_vm15, %v1007_v55 }
 0x1e8   :  { %872 = vmatprep.subr.bf16.mxu1 %v1005_v52 }
 0x1eb   :  { %874 = vmatpush3.bf16.msra.mxu1 %v873_v15 }
 0x1ec   :  { %875 = vmatprep.subr.bf16.mxu1 %v1005_v52 }
 0x1ef   :  { %877 = vmatpush3.bf16.msra.mxu1 %v876_v18 }
 0x1f0   :  { %878 = vmatprep.subr.bf16.mxu1 %v1005_v52 }
 0x1f3   :  { %880 = vmatpush3.bf16.msra.mxu1 %v879_v21 }
 0x2b9   :  { %v586_v23 = vpop.f32.mrb[0].mxu1 }
 0x2ba   :  { %v587_v24 = vadd.f32 %v725_v22, %v586_v23  ;;  %v819_v25 = vpop.f32.mrb[1].mxu1 }
 0x2bc   :  { %v590_v26 = vmax.f32 %v587_v24, 0.0 }
 0x2be   :  { %837 = vmatmul.mubr.msk.f32.vlgmr.msra.gmra.mrb[2].mxu1 %vm595_vm0, %v590_v26 }
 0x391   :  { %v665_v29 = vpop.f32.mrb[2].mxu1 }
 0x392   :  { %v666_v30 = vadd.f32 %v727_v28, %v665_v29  ;;  %v838_v31 = vpop.f32.mrb[3].mxu1 }
 0x394   :  { %v680_v32 = vsel %vm671_vm1, -inf, %v666_v30  ;;  %v672_v33 = vmul.f32 %v666_v30, %v666_v30 }
 0x395   :  { %v681_v34 = vsel %vm674_vm2, %v680_v32, -inf }
 0x396   :  { %682 = vmax.xlane.f32.xlu0 %v681_v34  ;;  %v673_v35 = vsel %vm671_vm1, %v672_v33, 0.0 }
 0x397   :  { %v675_v36 = vsel %vm674_vm2, %v673_v35, 0.0 }
 0x398   :  { %676 = vadd.xlane.f32.xlu1 %v675_v36 }
 0x423   :  { %v683_v37 = vpop.xlane.xlu0 %682 }
 0x424   :  { %v684_v38 = vsub.f32 %v666_v30, %v683_v37 }
 0x425   :  { %v677_v42 = vpop.xlane.xlu1 %676 }
 0x426   :  { %v685_v0 = vmul.f32 1.442695, %v684_v38  ;;  %v678_v43 = vmax.f32 %v677_v42, 1e-24 }
 0x428   :  { %900 = vpow2.f32 %v685_v0 }
 0x429   :  { %902 = vrsqrt.f32 %v678_v43 }
 0x432   :  { %v901_v39 = vpop.eup %900 }
 0x433   :  { %v687_v40 = vsel %vm671_vm1, 0.0, %v901_v39  ;;  %v903_v45 = vpop.eup %902 }
 0x434   :  { %v688_v41 = vsel %vm674_vm2, %v687_v40, 0.0  ;;  %v691_v47 = vmul.f32 %v903_v45, %v666_v30 }
 0x435   :  { %689 = vadd.xlane.f32.xlu1 %v688_v41 }
 0x4c2   :  { %v690_v44 = vpop.xlane.xlu1 %689 }
 0x4c3   :  { %904 = vrcp.f32 %v690_v44 }
 0x4cd   :  { %v905_v46 = vpop.eup %904 }
 0x4ce   :  { %v693_v48 = vmul.f32 %v905_v46, %v901_v39 }
 0x4d0   :  { %v694_v49 = vsel %vm671_vm1, %v691_v47, %v693_v48 }
 0x4d1   :  { %695 = vst.msk [vmem:[#allocation8] sm:$0xf] %vm674_vm2, %v694_v49 }
 0x4d2   :  { %983 = shalt.err (!%p980_p0)
}
 0x4d3   :  { %s984_s25 = scalar_lea.hbm %s1189_s3, 64 }
 0x4d4   :  { %p985_p1 = scmp.ne.s32.totalorder %s1189_s3, %s984_s25  ;;  %p988_p2 = scmp.lt.u32.totalorder %s984_s25, %s1189_s3 }
 0x4d6   :  { %p990_p3 = pnand %p988_p2, %p985_p1 }
 0x4d8   :  { %993 = shalt.err (!%p990_p3)
}
 0x4d9   :  { %705 = dma.vmem_to_hbm [thread:$0]  %s703_s21, 64, %s1189_s3, [#allocation4]  }
 0x4da   :  { %998 = dma.done.wait [#allocation4], 64  }
 0x4db   :  { %999 = vsyncadd [#allocation4], 4294967232 }
 0x4dc   :  { %709 = vsyncpa [#allocation3], 1 }
 0x4dd   :  { %710 = vsyncpa [#allocation6], 1 }
 0x4de   :  { %711 = vsyncpa [#allocation4], 1 }

</bundles_post_ra>
